<compile_context>
chip_gen: v6e
topology: v6e:2x2x1
jax: 0.10.0
libtpu: 0.0.40
codegen_flags: <defaults>
</compile_context>

<pallas_src>
import jax
import jax.numpy as jnp
from jax.experimental import pallas as pl
from jax.experimental.pallas import tpu as pltpu


# ----------------------------------------------------------------------------
# Kernel bodies
# ----------------------------------------------------------------------------

def _pc_step(i_rate, w_f32, bu, x, y, ny):
    """One PC inference step on VMEM-resident tiles (all f32)."""
    # top-down prediction: (B, next) @ (next, layer_tile) on the MXU
    pred = jnp.dot(ny, w_f32, preferred_element_type=jnp.float32)
    e = y - pred
    x_new = x + i_rate * (bu - e)
    y_new = jax.nn.sigmoid(x_new - 3.0)
    return e, x_new, y_new


def _pclayer_step_kernel(i_rate_ref, w_ref, bu_ref, x_ref, y_ref, ny_ref,
                         out_ref):
    """Single inference step; output slab rows are [e, x_new, y_new]."""
    i_rate = i_rate_ref[0]                       # SMEM scalar
    w = w_ref[...].astype(jnp.float32)           # bf16 -> f32 in vregs
    e, x_new, y_new = _pc_step(i_rate, w,
                               bu_ref[...], x_ref[...], y_ref[...], ny_ref[...])
    out_ref[0] = e.astype(out_ref.dtype)
    out_ref[1] = x_new.astype(out_ref.dtype)
    out_ref[2] = y_new.astype(out_ref.dtype)


def _pclayer_fused_kernel(i_rate_ref, w_ref, bu_ref, x0_ref, y0_ref, ny_ref,
                          out_ref):
    """T fused inference steps (grid axis 0). W, bu, ny and the output slab
    keep the same block index every step, so they stay resident in VMEM; the
    x / y carry lives in rows 1 / 2 of the output slab."""
    @pl.when(pl.program_id(0) == 0)
    def _():
        out_ref[1] = x0_ref[...]
        out_ref[2] = y0_ref[...]

    i_rate = i_rate_ref[0]
    w = w_ref[...].astype(jnp.float32)
    e, x_new, y_new = _pc_step(i_rate, w,
                               bu_ref[...], out_ref[1], out_ref[2], ny_ref[...])
    out_ref[0] = e
    out_ref[1] = x_new
    out_ref[2] = y_new


# ----------------------------------------------------------------------------
# Wrappers
# ----------------------------------------------------------------------------

def _pick_layer_tile(layer_size):
    """Tile the layer (output) dimension for large layers; keep it lane-dense."""
    if layer_size <= 1024:
        return layer_size
    for t in (2048, 1024, 512, 256, 128):
        if layer_size % t == 0:
            return t
    return layer_size


def _prep_inputs(bu_errors, x_activation, y_activity, nextlayer_y_activity,
                 inference_rate):
    squeeze = bu_errors.ndim == 1
    bu = jnp.atleast_2d(bu_errors).astype(jnp.float32)
    x = jnp.atleast_2d(x_activation).astype(jnp.float32)
    y = jnp.atleast_2d(y_activity).astype(jnp.float32)
    ny = jnp.atleast_2d(nextlayer_y_activity).astype(jnp.float32)
    i_rate = jnp.asarray(inference_rate, dtype=jnp.float32).reshape(1)
    return squeeze, bu, x, y, ny, i_rate


def pclayer_forward(weights, bu_errors, x_activation, y_activity,
                    nextlayer_y_activity, inference_rate):
    """One inference step of the PC layer.

    Args:
      weights: (nextlayer_size, layer_size), f32 or bf16 (bf16 recommended).
      bu_errors, x_activation, y_activity: (layer_size,) or (B, layer_size).
      nextlayer_y_activity: (nextlayer_size,) or (B, nextlayer_size).
      inference_rate: python float or scalar.

    Returns:
      (e_activity, x_activation, y_activity), same leading shape as inputs.
    """
    nextlayer_size, layer_size = weights.shape
    squeeze, bu, x, y, ny, i_rate = _prep_inputs(
        bu_errors, x_activation, y_activity, nextlayer_y_activity,
        inference_rate)
    batch = bu.shape[0]

    tn = _pick_layer_tile(layer_size)
    num_tiles = layer_size // tn

    smem_spec = pl.BlockSpec(memory_space=pltpu.MemorySpace.SMEM)
    w_spec = pl.BlockSpec((nextlayer_size, tn), lambda j: (0, j))
    vec_spec = pl.BlockSpec((batch, tn), lambda j: (0, j))
    ny_spec = pl.BlockSpec((batch, nextlayer_size), lambda j: (0, 0))
    out_spec = pl.BlockSpec((3, batch, tn), lambda j: (0, 0, j))

    out = pl.pallas_call(
        _pclayer_step_kernel,
        out_shape=jax.ShapeDtypeStruct((3, batch, layer_size), jnp.float32),
        grid=(num_tiles,),
        in_specs=[smem_spec, w_spec, vec_spec, vec_spec, vec_spec, ny_spec],
        out_specs=out_spec,
        compiler_params=pltpu.CompilerParams(
            dimension_semantics=("parallel",)),
    )(i_rate, weights, bu, x, y, ny)

    e, x_new, y_new = out[0], out[1], out[2]
    if squeeze:
        e, x_new, y_new = e[0], x_new[0], y_new[0]
    return e, x_new, y_new


def pclayer_run_inference(weights, bu_errors, x_activation, y_activity,
                          nextlayer_y_activity, inference_rate, num_steps):
    """Runs `num_steps` fused inference steps with bu_errors and
    nextlayer_y_activity held fixed. One pallas_call; W stays in VMEM."""
    nextlayer_size, layer_size = weights.shape
    squeeze, bu, x, y, ny, i_rate = _prep_inputs(
        bu_errors, x_activation, y_activity, nextlayer_y_activity,
        inference_rate)
    batch = bu.shape[0]

    resident = lambda t: (0, 0)
    smem_spec = pl.BlockSpec(memory_space=pltpu.MemorySpace.SMEM)
    w_spec = pl.BlockSpec((nextlayer_size, layer_size), resident)
    vec_spec = pl.BlockSpec((batch, layer_size), resident)
    ny_spec = pl.BlockSpec((batch, nextlayer_size), resident)
    out_spec = pl.BlockSpec((3, batch, layer_size), lambda t: (0, 0, 0))

    out = pl.pallas_call(
        _pclayer_fused_kernel,
        out_shape=jax.ShapeDtypeStruct((3, batch, layer_size), jnp.float32),
        grid=(num_steps,),
        in_specs=[smem_spec, w_spec, vec_spec, vec_spec, vec_spec, ny_spec],
        out_specs=out_spec,
        compiler_params=pltpu.CompilerParams(
            dimension_semantics=("arbitrary",)),
    )(i_rate, weights, bu, x, y, ny)

    e, x_new, y_new = out[0], out[1], out[2]
    if squeeze:
        e, x_new, y_new = e[0], x_new[0], y_new[0]
    return e, x_new, y_new


# ----------------------------------------------------------------------------
# Init + reference
# ----------------------------------------------------------------------------

def init_pclayer_weights(key, layer_size, nextlayer_size, dtype=jnp.bfloat16):
    """Matches pclayer.__init__: N(0, 0.5), scaled by 1/next, clamped >= 0."""
    w = 0.5 * jax.random.normal(key, (nextlayer_size, layer_size),
                                dtype=jnp.float32)
    w = w * (1.0 / nextlayer_size)
    w = jnp.maximum(w, 0.0)     # torch.clamp(min=0); (a_min kwarg was removed)
    return w.astype(dtype)      # bf16 storage halves HBM weight traffic


def pclayer_forward_ref(weights, bu, x, y, ny, i_rate):
    """Pure-JAX reference (works for 1-D vectors or (B, N) batches)."""
    w = weights.astype(jnp.float32)
    pred = jnp.matmul(ny, w, precision=jax.lax.Precision.HIGHEST)
    e = y - pred
    x_new = x + i_rate * (bu - e)
    y_new = jax.nn.sigmoid(x_new - 3.0)
    return e, x_new, y_new


# ----------------------------------------------------------------------------
# Demo / correctness check
# ----------------------------------------------------------------------------

if __name__ == "__main__":
    layer_size = 256
    nextlayer_size = 128
    i_rate = 0.05

    key = jax.random.PRNGKey(0)
    kw, k1, k2, k3, k4 = jax.random.split(key, 5)

    weights = init_pclayer_weights(kw, layer_size, nextlayer_size,
                                   dtype=jnp.bfloat16)

    bu = jax.random.normal(k1, (layer_size,), dtype=jnp.float32)
    x = jax.random.normal(k2, (layer_size,), dtype=jnp.float32)
    y = jax.nn.sigmoid(jax.random.normal(k3, (layer_size,), dtype=jnp.float32))
    ny = jax.nn.sigmoid(jax.random.normal(k4, (nextlayer_size,),
                                          dtype=jnp.float32))

    tol = dict(atol=1e-3, rtol=1e-3)

    # --- single-step, single-vector forward (matches nn.Module.forward) ---
    e, x_new, y_new = pclayer_forward(weights, bu, x, y, ny, i_rate)
    jax.block_until_ready((e, x_new, y_new))
    e_r, x_r, y_r = pclayer_forward_ref(weights, bu, x, y, ny, i_rate)
    assert jnp.allclose(e, e_r, **tol)
    assert jnp.allclose(x_new, x_r, **tol)
    assert jnp.allclose(y_new, y_r, **tol)

    # --- batched forward (B samples share the same weights) ---
    B = 8
    kb1, kb2, kb3, kb4 = jax.random.split(jax.random.PRNGKey(1), 4)
    bu_b = jax.random.normal(kb1, (B, layer_size), dtype=jnp.float32)
    x_b = jax.random.normal(kb2, (B, layer_size), dtype=jnp.float32)
    y_b = jax.nn.sigmoid(jax.random.normal(kb3, (B, layer_size),
                                           dtype=jnp.float32))
    ny_b = jax.nn.sigmoid(jax.random.normal(kb4, (B, nextlayer_size),
                                            dtype=jnp.float32))
    e_b, x_nb, y_nb = pclayer_forward(weights, bu_b, x_b, y_b, ny_b, i_rate)
    jax.block_until_ready((e_b, x_nb, y_nb))
    e_br, x_br, y_br = pclayer_forward_ref(weights, bu_b, x_b, y_b, ny_b, i_rate)
    assert jnp.allclose(e_b, e_br, **tol)
    assert jnp.allclose(x_nb, x_br, **tol)
    assert jnp.allclose(y_nb, y_br, **tol)

    # --- fused multi-step inference (W + carry resident in VMEM) ---
    T = 8
    e_f, x_f, y_f = pclayer_run_inference(weights, bu, x, y, ny, i_rate, T)
    jax.block_until_ready((e_f, x_f, y_f))
    xr, yr = x, y
    for _ in range(T):
        er, xr, yr = pclayer_forward_ref(weights, bu, xr, yr, ny, i_rate)
    assert jnp.allclose(e_f, er, **tol)
    assert jnp.allclose(x_f, xr, **tol)
    assert jnp.allclose(y_f, yr, **tol)

    print("KERNEL_OK")
</pallas_src>

<mosaic_0001>
module attributes {stable_mosaic.version = 11 : i64} {
  func.func @_pclayer_step_kernel(%arg0: i32, %arg1: memref<1xf32, #tpu.memory_space<smem>>, %arg2: memref<128x256xbf16, #tpu.memory_space<vmem>>, %arg3: memref<1x256xf32, #tpu.memory_space<vmem>>, %arg4: memref<1x256xf32, #tpu.memory_space<vmem>>, %arg5: memref<1x256xf32, #tpu.memory_space<vmem>>, %arg6: memref<1x128xf32, #tpu.memory_space<vmem>>, %arg7: memref<3x1x256xf32, #tpu.memory_space<vmem>>) attributes {dimension_semantics = [#tpu.dimension_semantics<parallel>], iteration_bounds = array<i64: 1>, scalar_prefetch = 0 : i64, scratch_operands = 0 : i64, tpu.core_type = #tpu.core_type<tc>, window_params = [{transform_indices = @transform_0, window_bounds = array<i64: 1>}, {transform_indices = @transform_1, window_bounds = array<i64: 128, 256>}, {transform_indices = @transform_2, window_bounds = array<i64: 1, 256>}, {transform_indices = @transform_3, window_bounds = array<i64: 1, 256>}, {transform_indices = @transform_4, window_bounds = array<i64: 1, 256>}, {pipeline_mode = #tpu.pipeline_mode<synchronous>, transform_indices = @transform_5, window_bounds = array<i64: 1, 128>}, {transform_indices = @transform_6, window_bounds = array<i64: 3, 1, 256>}]} {
    %c0 = arith.constant 0 : index
    %0 = memref.load %arg1[%c0] : memref<1xf32, #tpu.memory_space<smem>>
    %c0_0 = arith.constant 0 : index
    %c0_1 = arith.constant 0 : index
    %1 = vector.load %arg2[%c0_0, %c0_1] : memref<128x256xbf16, #tpu.memory_space<vmem>>, vector<128x256xbf16>
    %2 = arith.extf %1 : vector<128x256xbf16> to vector<128x256xf32>
    %c0_2 = arith.constant 0 : index
    %c0_3 = arith.constant 0 : index
    %3 = vector.load %arg3[%c0_2, %c0_3] : memref<1x256xf32, #tpu.memory_space<vmem>>, vector<1x256xf32>
    %c0_4 = arith.constant 0 : index
    %c0_5 = arith.constant 0 : index
    %4 = vector.load %arg4[%c0_4, %c0_5] : memref<1x256xf32, #tpu.memory_space<vmem>>, vector<1x256xf32>
    %c0_6 = arith.constant 0 : index
    %c0_7 = arith.constant 0 : index
    %5 = vector.load %arg5[%c0_6, %c0_7] : memref<1x256xf32, #tpu.memory_space<vmem>>, vector<1x256xf32>
    %c0_8 = arith.constant 0 : index
    %c0_9 = arith.constant 0 : index
    %6 = vector.load %arg6[%c0_8, %c0_9] : memref<1x128xf32, #tpu.memory_space<vmem>>, vector<1x128xf32>
    %cst = arith.constant dense<0.000000e+00> : vector<1x256xf32>
    %7 = tpu.matmul %6, %2, %cst {dimension_numbers = #tpu.dot_dimension_numbers<[1], [0], [0], [1], [0, 0, 1, 1], [], []>} : vector<1x128xf32>, vector<128x256xf32>, vector<1x256xf32> -> vector<1x256xf32>
    %8 = arith.subf %5, %7 : vector<1x256xf32>
    %9 = arith.subf %3, %8 : vector<1x256xf32>
    %10 = vector.broadcast %0 : f32 to vector<1x256xf32>
    %11 = arith.mulf %10, %9 : vector<1x256xf32>
    %12 = arith.addf %4, %11 : vector<1x256xf32>
    %cst_10 = arith.constant 3.000000e+00 : f32
    %13 = vector.broadcast %cst_10 : f32 to vector<1x256xf32>
    %14 = arith.subf %12, %13 : vector<1x256xf32>
    %15 = arith.negf %14 : vector<1x256xf32>
    %16 = math.exp %15 : vector<1x256xf32>
    %cst_11 = arith.constant 1.000000e+00 : f32
    %17 = vector.broadcast %cst_11 : f32 to vector<1x256xf32>
    %18 = arith.addf %17, %16 : vector<1x256xf32>
    %19 = arith.divf %17, %18 : vector<1x256xf32>
    %c0_12 = arith.constant 0 : index
    %c0_13 = arith.constant 0 : index
    %c0_14 = arith.constant 0 : index
    %20 = vector.load %arg7[%c0_12, %c0_13, %c0_14] : memref<3x1x256xf32, #tpu.memory_space<vmem>>, vector<1x1x256xf32>
    %21 = vector.shape_cast %20 : vector<1x1x256xf32> to vector<1x256xf32>
    %22 = vector.shape_cast %8 : vector<1x256xf32> to vector<1x1x256xf32>
    tpu.vector_store %arg7[%c0_12, %c0_13, %c0_14], %22 {strides = array<i32>} : memref<3x1x256xf32, #tpu.memory_space<vmem>>, vector<1x1x256xf32>,
    %c1 = arith.constant 1 : index
    %c0_15 = arith.constant 0 : index
    %c0_16 = arith.constant 0 : index
    %23 = vector.load %arg7[%c1, %c0_15, %c0_16] : memref<3x1x256xf32, #tpu.memory_space<vmem>>, vector<1x1x256xf32>
    %24 = vector.shape_cast %23 : vector<1x1x256xf32> to vector<1x256xf32>
    %25 = vector.shape_cast %12 : vector<1x256xf32> to vector<1x1x256xf32>
    tpu.vector_store %arg7[%c1, %c0_15, %c0_16], %25 {strides = array<i32>} : memref<3x1x256xf32, #tpu.memory_space<vmem>>, vector<1x1x256xf32>,
    %c2 = arith.constant 2 : index
    %c0_17 = arith.constant 0 : index
    %c0_18 = arith.constant 0 : index
    %26 = vector.load %arg7[%c2, %c0_17, %c0_18] : memref<3x1x256xf32, #tpu.memory_space<vmem>>, vector<1x1x256xf32>
    %27 = vector.shape_cast %26 : vector<1x1x256xf32> to vector<1x256xf32>
    %28 = vector.shape_cast %19 : vector<1x256xf32> to vector<1x1x256xf32>
    tpu.vector_store %arg7[%c2, %c0_17, %c0_18], %28 {strides = array<i32>} : memref<3x1x256xf32, #tpu.memory_space<vmem>>, vector<1x1x256xf32>,
    return
  }
  func.func @transform_0(%arg0: i32) -> i32 {
    %c0_i32 = arith.constant 0 : i32
    %c0_i32_0 = arith.constant 0 : i32
    return %c0_i32 : i32
  }
  func.func @transform_1(%arg0: i32) -> (i32, i32) {
    %c0_i32 = arith.constant 0 : i32
    %c0_i32_0 = arith.constant 0 : i32
    return %c0_i32, %arg0 : i32, i32
  }
  func.func @transform_2(%arg0: i32) -> (i32, i32) {
    %c0_i32 = arith.constant 0 : i32
    %c0_i32_0 = arith.constant 0 : i32
    return %c0_i32, %arg0 : i32, i32
  }
  func.func @transform_3(%arg0: i32) -> (i32, i32) {
    %c0_i32 = arith.constant 0 : i32
    %c0_i32_0 = arith.constant 0 : i32
    return %c0_i32, %arg0 : i32, i32
  }
  func.func @transform_4(%arg0: i32) -> (i32, i32) {
    %c0_i32 = arith.constant 0 : i32
    %c0_i32_0 = arith.constant 0 : i32
    return %c0_i32, %arg0 : i32, i32
  }
  func.func @transform_5(%arg0: i32) -> (i32, i32) {
    %c0_i32 = arith.constant 0 : i32
    %c0_i32_0 = arith.constant 0 : i32
    %c0_i32_1 = arith.constant 0 : i32
    return %c0_i32, %c0_i32_0 : i32, i32
  }
  func.func @transform_6(%arg0: i32) -> (i32, i32, i32) {
    %c0_i32 = arith.constant 0 : i32
    %c0_i32_0 = arith.constant 0 : i32
    %c0_i32_1 = arith.constant 0 : i32
    return %c0_i32, %c0_i32_0, %arg0 : i32, i32, i32
  }
}

</mosaic_0001>

<bundles_post_ra>
// kernel: tpu_custom_call.1
= control target key start
LH: loop header
LB: loop body
LE: loop exit
PB: predicated region body
PF: predicated region fallthrough
CT: control target
= control target key end

     0   :  { %12 = vsyncpa [#allocation4], 0  ;;  %s351_s0 = inlined_call_operand.<no memory space> [shape: f32[1], index: 0, kind: input, shape index: {}]   ;;  %s352_s1 = inlined_call_operand.hbm [shape: bf16[128,256], index: 1, kind: input, shape index: {}]   ;;  %s353_s2 = inlined_call_operand.vmem [shape: f32[1,256], index: 2, kind: input, shape index: {}]   ;;  %s354_s3 = inlined_call_operand.vmem [shape: f32[1,256], index: 3, kind: input, shape index: {}]   ;;  %s355_s4 = inlined_call_operand.vmem [shape: f32[1,256], index: 4, kind: input, shape index: {}]   ;;  %s356_s5 = inlined_call_operand.vmem [shape: f32[1,128], index: 5, kind: input, shape index: {}]   ;;  %s357_s6 = inlined_call_operand.hbm [shape: f32[3,1,256], index: 6, kind: output, shape index: {}]  }
   0x1   :  { %13 = vsyncpa [#allocation5], 0  ;;  %s277_s21 = smov [#allocation3]  }
   0x2   :  { %s21_s22 = sshll.u32 %s277_s21, 4  ;;  %s22_s22 = int_to_ptr.vmem [resolvable:$true] %s21_s22 }
   0x3   :  { %s241_s23 = scalar_lea.vmem %s22_s22, 2048  ;;  %p246_p1 = scmp.lt.s32.totalorder %s22_s22, %s22_s22 }
   0x4   :  { %p242_p0 = scmp.ne.s32.totalorder %s22_s22, %s241_s23  ;;  %p247_p2 = scmp.lt.s32.totalorder %s241_s23, %s241_s23 }
   0x6   :  { %p248_p3 = por %p247_p2, %p246_p1 }
   0x8   :  { %p249_p4 = pnand %p248_p3, %p242_p0 }
   0xa   :  { %252 = shalt.err (!%p249_p4)
}
   0xb   :  { %s278_s24 = smov 128   ;;  %s279_s25 = smov 8  }
   0xc   :  { %27 = dma.hbm_to_vmem [thread:$0]  %s352_s1, 2048, %s22_s22, [#allocation4], %s278_s24, %s278_s24, %s279_s25  }
   0xd   :  { %273 = dma.done.wait [#allocation4], 2048  }
   0xe   :  { %274 = vsyncadd [#allocation4], 4294965248  ;;  %v280_v0 = vmov 0.0   ;;  %v55_v1 = vld [vmem:[#allocation3 + $0x78] sm:$0xff]  ;;  %v54_v2 = vld [vmem:[#allocation3 + $0x70] sm:$0xff]  ;;  %v169_v52 = vlaneseq }
   0xf   :  { %156 = vmatprep.mubr.f32.mxu0 %v280_v0  ;;  %v53_v3 = vld [vmem:[#allocation3 + $0x68] sm:$0xff]  ;;  %v87_v4 = vunpack.c.h.bf16 %v55_v1  ;;  %v86_v5 = vunpack.c.l.bf16 %v55_v1  ;;  %v85_v6 = vunpack.c.h.bf16 %v54_v2  ;;  %v84_v7 = vunpack.c.l.bf16 %v54_v2  ;;  %v52_v8 = vld [vmem:[#allocation3 + $0x60] sm:$0xff]  ;;  %v51_v11 = vld [vmem:[#allocation3 + $0x58] sm:$0xff] }
  0x10   :  { %v83_v9 = vunpack.c.h.bf16 %v53_v3  ;;  %v82_v10 = vunpack.c.l.bf16 %v53_v3  ;;  %v81_v12 = vunpack.c.h.bf16 %v52_v8  ;;  %v80_v13 = vunpack.c.l.bf16 %v52_v8  ;;  %v50_v14 = vld [vmem:[#allocation3 + $0x50] sm:$0xff]  ;;  %v49_v17 = vld [vmem:[#allocation3 + $0x48] sm:$0xff]  ;;  %v48_v20 = vld [vmem:[#allocation3 + $0x40] sm:$0xff] }
  0x11   :  { %92 = vmatprep.subr.mxu0 %v87_v4  ;;  %v79_v15 = vunpack.c.h.bf16 %v51_v11  ;;  %v78_v16 = vunpack.c.l.bf16 %v51_v11  ;;  %v77_v18 = vunpack.c.h.bf16 %v50_v14  ;;  %v76_v19 = vunpack.c.l.bf16 %v50_v14  ;;  %v47_v23 = vld [vmem:[#allocation3 + $0x38] sm:$0xff]  ;;  %v46_v26 = vld [vmem:[#allocation3 + $0x30] sm:$0xff]  ;;  %v45_v29 = vld [vmem:[#allocation3 + $0x28] sm:$0xff] }
  0x12   :  { %93 = vmatpush1.msra.mxu0 %v86_v5  ;;  %v75_v21 = vunpack.c.h.bf16 %v49_v17  ;;  %v74_v22 = vunpack.c.l.bf16 %v49_v17  ;;  %v73_v24 = vunpack.c.h.bf16 %v48_v20  ;;  %v72_v25 = vunpack.c.l.bf16 %v48_v20  ;;  %v44_v32 = vld [vmem:[#allocation3 + $0x20] sm:$0xff]  ;;  %v43_v35 = vld [vmem:[#allocation3 + $0x18] sm:$0xff]  ;;  %v42_v38 = vld [vmem:[#allocation3 + $0x10] sm:$0xff] }
  0x13   :  { %94 = vmatprep.subr.mxu0 %v85_v6  ;;  %v71_v27 = vunpack.c.h.bf16 %v47_v23  ;;  %v70_v28 = vunpack.c.l.bf16 %v47_v23  ;;  %v69_v30 = vunpack.c.h.bf16 %v46_v26  ;;  %v68_v31 = vunpack.c.l.bf16 %v46_v26  ;;  %v41_v41 = vld [vmem:[#allocation3 + $0x8] sm:$0xff]  ;;  %v40_v44 = vld [vmem:[#allocation3] sm:$0xff] }
  0x14   :  { %95 = vmatpush1.msra.mxu0 %v84_v7  ;;  %v67_v33 = vunpack.c.h.bf16 %v45_v29  ;;  %v66_v34 = vunpack.c.l.bf16 %v45_v29  ;;  %v65_v36 = vunpack.c.h.bf16 %v44_v32  ;;  %v64_v37 = vunpack.c.l.bf16 %v44_v32  ;;  %v91_v49 = vld [vmem:[%s356_s5] sm:$0x1] }
  0x15   :  { %96 = vmatprep.subr.mxu0 %v83_v9  ;;  %v63_v39 = vunpack.c.h.bf16 %v43_v35  ;;  %v62_v40 = vunpack.c.l.bf16 %v43_v35  ;;  %v61_v42 = vunpack.c.h.bf16 %v42_v38  ;;  %v60_v43 = vunpack.c.l.bf16 %v42_v38  ;;  %v90_v60 = vld [vmem:[%s355_s4] sm:$0x3] }
  0x16   :  { %97 = vmatpush1.msra.mxu0 %v82_v10  ;;  %v59_v45 = vunpack.c.h.bf16 %v41_v41  ;;  %v58_v46 = vunpack.c.l.bf16 %v41_v41  ;;  %v57_v47 = vunpack.c.h.bf16 %v40_v44  ;;  %v56_v48 = vunpack.c.l.bf16 %v40_v44  ;;  %v88_v62 = vld [vmem:[%s353_s2] sm:$0x3] }
  0x17   :  { %98 = vmatprep.subr.mxu0 %v81_v12  ;;  %v281_v50 = vmov 1966171168   ;;  %v170_v54 = vshrl.u32 %v169_v52, 7  ;;  %vm332_vm0 = vcmp.lt.s32.totalorder %v169_v52, 256  ;;  %v183_v1 = vstv %s351_s0  ;;  %v89_v3 = vld [vmem:[%s354_s3] sm:$0x3] }
  0x18   :  { %99 = vmatpush1.msra.mxu0 %v80_v13  ;;  %v167_v51 = vunpack.c.l.s4 %v281_v50  ;;  %s282_s0 = smov [#allocation6]  }
  0x19   :  { %100 = vmatprep.subr.mxu0 %v79_v15  ;;  %s207_s2 = sshll.u32 %s282_s0, 4  ;;  %s208_s2 = int_to_ptr.vmem [resolvable:$true] %s207_s2 }
  0x1a   :  { %101 = vmatpush1.msra.mxu0 %v78_v16  ;;  %v168_v53 = vunpack.c.0.s8 %v167_v51  ;;  %s253_s11 = scalar_lea.vmem %s208_s2, 96  ;;  %p258_p6 = scmp.lt.s32.totalorder %s208_s2, %s208_s2 }
  0x1b   :  { %102 = vmatprep.subr.mxu0 %v77_v18  ;;  %p254_p5 = scmp.ne.s32.totalorder %s208_s2, %s253_s11  ;;  %p259_p7 = scmp.lt.s32.totalorder %s253_s11, %s253_s11 }
  0x1c   :  { %103 = vmatpush1.msra.mxu0 %v76_v19  ;;  %v171_v56 = vsub.s32 %v168_v53, %v170_v54 }
  0x1d   :  { %104 = vmatprep.subr.mxu0 %v75_v21  ;;  %p260_p8 = por %p259_p7, %p258_p6 }
  0x1e   :  { %105 = vmatpush1.msra.mxu0 %v74_v22 }
  0x1f   :  { %106 = vmatprep.subr.mxu0 %v73_v24  ;;  %p261_p9 = pnand %p260_p8, %p254_p5 }
  0x20   :  { %107 = vmatpush1.msra.mxu0 %v72_v25 }
  0x21   :  { %108 = vmatprep.subr.mxu0 %v71_v27 }
  0x22   :  { %109 = vmatpush1.msra.mxu0 %v70_v28 }
  0x23   :  { %110 = vmatprep.subr.mxu0 %v69_v30 }
  0x24   :  { %111 = vmatpush1.msra.mxu0 %v68_v31 }
  0x25   :  { %112 = vmatprep.subr.mxu0 %v67_v33 }
  0x26   :  { %113 = vmatpush1.msra.mxu0 %v66_v34 }
  0x27   :  { %114 = vmatprep.subr.mxu0 %v65_v36 }
  0x28   :  { %115 = vmatpush1.msra.mxu0 %v64_v37 }
  0x29   :  { %116 = vmatprep.subr.mxu0 %v63_v39 }
  0x2a   :  { %117 = vmatpush1.msra.mxu0 %v62_v40 }
  0x2b   :  { %118 = vmatprep.subr.mxu0 %v61_v42 }
  0x2c   :  { %119 = vmatpush1.msra.mxu0 %v60_v43 }
  0x2d   :  { %120 = vmatprep.subr.mxu0 %v59_v45 }
  0x2e   :  { %121 = vmatpush1.msra.mxu0 %v58_v46 }
  0x2f   :  { %122 = vmatprep.subr.mxu0 %v57_v47 }
  0x30   :  { %123 = vmatpush1.msra.mxu0 %v56_v48 }
  0x31   :  { %157 = vmatmul.mubr.f32.vlgmr.msra.gmra.mxu0 %v91_v49 }
  0xf1   :  { %v158_v55 = vpop.f32.mrf.mxu0 }
  0xf3   :  { %v160_v57 = vpop.f32.mrf.mxu0 }
  0xf4   :  { %v165_v58 = vcombine.low %v158_v55, %v160_v57 }
  0xf6   :  { %v172_v59 = vrot.slane %v165_v58, %v171_v56 }
  0xf8   :  { %v179_v61 = vrot.slane %v172_v59, %v171_v56 }
  0xfa   :  { %v181_v0 = vsub.f32 %v90_v60, %v179_v61 }
  0xfc   :  { %v182_v2 = vsub.f32 %v88_v62, %v181_v0  ;;  %197 = vst.msk [vmem:[#allocation6] sm:$0x3] %vm332_vm0, %v181_v0 }
  0xfe   :  { %v184_v4 = vmul.f32 %v183_v1, %v182_v2 }
 0x100   :  { %v185_v5 = vadd.f32 %v184_v4, %v89_v3 }
 0x102   :  { %v219_v6 = vadd.f32 -3.0, %v185_v5  ;;  %199 = vst.msk [vmem:[#allocation6 + $0x2] sm:$0x3] %vm332_vm0, %v185_v5 }
 0x104   :  { %v220_v7 = vmul.f32 -1.442695, %v219_v6 }
 0x106   :  { %229 = vpow2.f32 %v220_v7 }
 0x113   :  { %v230_v8 = vpop.eup %229 }
 0x114   :  { %v190_v9 = vadd.f32 1.0, %v230_v8 }
 0x116   :  { %231 = vrcp.f32 %v190_v9 }
 0x123   :  { %v232_v10 = vpop.eup %231 }
 0x124   :  { %201 = vst.msk [vmem:[#allocation6 + $0x4] sm:$0x3] %vm332_vm0, %v232_v10 }
 0x125   :  { %264 = shalt.err (!%p261_p9)
}
 0x126   :  { %s283_s3 = smov 32   ;;  %s284_s12 = smov 2  }
 0x127   :  { %213 = dma.vmem_to_hbm [thread:$0]  %s208_s2, 96, %s357_s6, [#allocation5], %s283_s3, %s283_s3, %s284_s12  }
 0x128   :  { %275 = dma.done.wait [#allocation5], 96  }
 0x129   :  { %276 = vsyncadd [#allocation5], 4294967200 }
 0x12a   :  { %217 = vsyncpa [#allocation4], 1 }
 0x12b   :  { %218 = vsyncpa [#allocation5], 1 }

</bundles_post_ra>
